<compile_context>
chip_gen: v5e
topology: v5e:2x2
jax: 0.10.0
libtpu: 0.0.40
codegen_flags: <defaults>
</compile_context>

<pallas_src>
import functools

import jax
import jax.numpy as jnp
from jax import lax
from jax.experimental import pallas as pl
from jax.experimental.pallas import tpu as pltpu

EPS = 1e-15  # matches nn.LayerNorm(normalized_shape=output_dim, eps=1e-15)


def _round_up(x, m):
    return ((x + m - 1) // m) * m


def _linear_layernorm_kernel(x_ref, w_ref, b_ref, gamma_ref, beta_ref, o_ref,
                             *, d_out_valid):
    # x_ref:     (TM, D_in)        input-row tile (native dtype)
    # w_ref:     (D_in, D_out_pad) transposed weight, resident across the grid
    # b_ref:     (1, D_out_pad)
    # gamma_ref: (1, D_out_pad)
    # beta_ref:  (1, D_out_pad)
    # o_ref:     (TM, D_out_pad)
    # Native-dtype operands into the MXU, f32 accumulator.
    y = jnp.dot(x_ref[...], w_ref[...], preferred_element_type=jnp.float32)
    y = y + b_ref[...].astype(jnp.float32)

    d_pad = y.shape[-1]
    inv_d = 1.0 / float(d_out_valid)

    if d_out_valid == d_pad:
        mean = jnp.mean(y, axis=-1, keepdims=True)
        centered = y - mean
        var = jnp.mean(centered * centered, axis=-1, keepdims=True)
    else:
        # Padded columns of W/b are zero -> y is exactly 0 there, so a plain
        # sum is already the sum over the real D_out columns.
        mean = jnp.sum(y, axis=-1, keepdims=True) * inv_d
        centered = y - mean
        lane = lax.broadcasted_iota(jnp.int32, y.shape, 1)
        cm = jnp.where(lane < d_out_valid, centered, 0.0)
        var = jnp.sum(cm * cm, axis=-1, keepdims=True) * inv_d

    y_norm = centered * lax.rsqrt(var + EPS)  # EUP rsqrt, no divide
    out = (y_norm * gamma_ref[...].astype(jnp.float32)
           + beta_ref[...].astype(jnp.float32))
    o_ref[...] = out.astype(o_ref.dtype)


def linear_encoder_pallas(x, weight, bias, gamma, beta, *,
                          tile_rows=256,
                          vmem_budget_bytes=48 * 1024 * 1024):
    """x: (..., D_in); weight: torch-style (D_out, D_in); bias/gamma/beta: (D_out,)."""
    orig_shape = x.shape
    d_in = orig_shape[-1]
    d_out = weight.shape[0]
    x2d = x.reshape(-1, d_in)
    n = x2d.shape[0]

    # ---- lane-dense output: pad feature dim of the *parameters* to 128 ----
    d_out_pad = _round_up(d_out, 128)
    w_t = weight.T  # (D_in, D_out)
    if d_out_pad != d_out:
        pad_c = d_out_pad - d_out
        w_t = jnp.pad(w_t, ((0, 0), (0, pad_c)))
        bias_p = jnp.pad(bias, (0, pad_c))
        gamma_p = jnp.pad(gamma, (0, pad_c))
        beta_p = jnp.pad(beta, (0, pad_c))
    else:
        bias_p, gamma_p, beta_p = bias, gamma, beta
    b2 = bias_p.reshape(1, d_out_pad)
    g2 = gamma_p.reshape(1, d_out_pad)
    be2 = beta_p.reshape(1, d_out_pad)

    # ---- pick row-tile size: big, multiple of 8, within the VMEM budget ----
    tm = min(int(tile_rows), _round_up(n, 8))
    tm = max(8, (tm // 8) * 8)

    x_item = jnp.dtype(x.dtype).itemsize
    w_item = jnp.dtype(w_t.dtype).itemsize
    w_bytes = d_in * d_out_pad * w_item

    def _vmem_needed(tm_):
        return (2 * w_bytes                       # resident W^T (double-buffered)
                + 2 * tm_ * d_in * x_item         # x tile (double-buffered)
                + 2 * tm_ * d_out_pad * x_item    # out tile (double-buffered)
                + 4 * tm_ * d_out_pad * 4         # f32 accumulator / LN temps headroom
                + 3 * 2 * d_out_pad * 4)          # bias / gamma / beta

    while tm > 8 and _vmem_needed(tm) > vmem_budget_bytes:
        tm = max(8, (tm // 2 // 8) * 8)

    vmem_limit = int(min(max(_vmem_needed(tm) + (4 << 20), 32 << 20), 60 << 20))

    grid = (pl.cdiv(n, tm),)  # no host-side padding; Pallas masks the tail tile

    cost = pl.CostEstimate(
        flops=2 * n * d_in * d_out,
        transcendentals=n,
        bytes_accessed=(n * d_in + n * d_out) * x_item + w_bytes
                       + 3 * d_out_pad * 4,
    )

    kernel = functools.partial(_linear_layernorm_kernel, d_out_valid=d_out)

    out = pl.pallas_call(
        kernel,
        out_shape=jax.ShapeDtypeStruct((n, d_out_pad), x.dtype),
        grid_spec=pltpu.PrefetchScalarGridSpec(
            num_scalar_prefetch=0,
            grid=grid,
            in_specs=[
                pl.BlockSpec((tm, d_in), lambda i: (i, 0)),        # x tile
                pl.BlockSpec((d_in, d_out_pad), lambda i: (0, 0)),  # W^T (resident)
                pl.BlockSpec((1, d_out_pad), lambda i: (0, 0)),     # bias
                pl.BlockSpec((1, d_out_pad), lambda i: (0, 0)),     # LN gamma
                pl.BlockSpec((1, d_out_pad), lambda i: (0, 0)),     # LN beta
            ],
            out_specs=pl.BlockSpec((tm, d_out_pad), lambda i: (i, 0)),
        ),
        compiler_params=pltpu.CompilerParams(
            dimension_semantics=("parallel",),   # lets v7x shard rows across its 2 TCs
            vmem_limit_bytes=vmem_limit,
        ),
        cost_estimate=cost,
    )(x2d, w_t, b2, g2, be2)

    out = out[:, :d_out]
    return out.reshape(*orig_shape[:-1], d_out)


if __name__ == "__main__":
    # Small, deterministic setup consistent with LinearEncoder(input_dim, output_dim).
    B, S = 2, 8
    input_dim, output_dim = 32, 64

    key = jax.random.PRNGKey(0)
    k_x, k_w, k_b = jax.random.split(key, 3)

    x = jax.random.normal(k_x, (B, S, input_dim), dtype=jnp.float32)

    # nn.Linear params: weight (out, in), bias (out,)  -- deterministic init.
    bound = 1.0 / (input_dim ** 0.5)
    weight = jax.random.uniform(k_w, (output_dim, input_dim),
                                minval=-bound, maxval=bound, dtype=jnp.float32)
    bias = jax.random.uniform(k_b, (output_dim,),
                              minval=-bound, maxval=bound, dtype=jnp.float32)

    # nn.LayerNorm params: gamma=1, beta=0 (default init).
    gamma = jnp.ones((output_dim,), dtype=jnp.float32)
    beta = jnp.zeros((output_dim,), dtype=jnp.float32)

    out = linear_encoder_pallas(x, weight, bias, gamma, beta)
    jax.block_until_ready(out)

    # Lightweight sanity check against pure-JAX reference.
    y_ref = x @ weight.T + bias
    mean = y_ref.mean(-1, keepdims=True)
    var = ((y_ref - mean) ** 2).mean(-1, keepdims=True)
    ref = (y_ref - mean) / jnp.sqrt(var + EPS) * gamma + beta
    assert out.shape == (B, S, output_dim)
    assert jnp.allclose(out, ref, atol=1e-4, rtol=1e-4)

    print("KERNEL_OK")
</pallas_src>

<mosaic_0001>
module attributes {stable_mosaic.version = 11 : i64} {
  func.func @_linear_layernorm_kernel(%arg0: i32, %arg1: memref<16x32xf32, #tpu.memory_space<vmem>>, %arg2: memref<32x128xf32, #tpu.memory_space<vmem>>, %arg3: memref<1x128xf32, #tpu.memory_space<vmem>>, %arg4: memref<1x128xf32, #tpu.memory_space<vmem>>, %arg5: memref<1x128xf32, #tpu.memory_space<vmem>>, %arg6: memref<16x128xf32, #tpu.memory_space<vmem>>) attributes {dimension_semantics = [#tpu.dimension_semantics<parallel>], iteration_bounds = array<i64: 1>, scalar_prefetch = 0 : i64, scratch_operands = 0 : i64, tpu.core_type = #tpu.core_type<tc>, window_params = [{transform_indices = @transform_0, window_bounds = array<i64: 16, 32>}, {pipeline_mode = #tpu.pipeline_mode<synchronous>, transform_indices = @transform_1, window_bounds = array<i64: 32, 128>}, {pipeline_mode = #tpu.pipeline_mode<synchronous>, transform_indices = @transform_2, window_bounds = array<i64: 1, 128>}, {pipeline_mode = #tpu.pipeline_mode<synchronous>, transform_indices = @transform_3, window_bounds = array<i64: 1, 128>}, {pipeline_mode = #tpu.pipeline_mode<synchronous>, transform_indices = @transform_4, window_bounds = array<i64: 1, 128>}, {transform_indices = @transform_5, window_bounds = array<i64: 16, 128>}]} {
    %c0 = arith.constant 0 : index
    %c0_0 = arith.constant 0 : index
    %0 = vector.load %arg1[%c0, %c0_0] : memref<16x32xf32, #tpu.memory_space<vmem>>, vector<16x32xf32>
    %c0_1 = arith.constant 0 : index
    %c0_2 = arith.constant 0 : index
    %1 = vector.load %arg2[%c0_1, %c0_2] : memref<32x128xf32, #tpu.memory_space<vmem>>, vector<32x128xf32>
    %cst = arith.constant dense<0.000000e+00> : vector<16x128xf32>
    %2 = tpu.matmul %0, %1, %cst {dimension_numbers = #tpu.dot_dimension_numbers<[1], [0], [0], [1], [0, 0, 1, 1], [], []>} : vector<16x32xf32>, vector<32x128xf32>, vector<16x128xf32> -> vector<16x128xf32>
    %c0_3 = arith.constant 0 : index
    %c0_4 = arith.constant 0 : index
    %3 = vector.load %arg3[%c0_3, %c0_4] : memref<1x128xf32, #tpu.memory_space<vmem>>, vector<1x128xf32>
    %4 = vector.broadcast %3 : vector<1x128xf32> to vector<16x128xf32>
    %5 = arith.addf %2, %4 : vector<16x128xf32>
    %cst_5 = arith.constant dense<0.000000e+00> : vector<16xf32>
    %6 = vector.multi_reduction <add>, %5, %cst_5 [1] : vector<16x128xf32> to vector<16xf32>
    %7 = vector.shape_cast %6 : vector<16xf32> to vector<16x1xf32>
    %cst_6 = arith.constant 1.562500e-02 : f32
    %8 = vector.broadcast %cst_6 : f32 to vector<16x1xf32>
    %9 = arith.mulf %7, %8 : vector<16x1xf32>
    %10 = vector.broadcast %9 : vector<16x1xf32> to vector<16x128xf32>
    %11 = arith.subf %5, %10 : vector<16x128xf32>
    %12 = tpu.iota {dimensions = array<i32: 1>} : vector<16x128xi32>
    %c64_i32 = arith.constant 64 : i32
    %13 = vector.broadcast %c64_i32 : i32 to vector<16x128xi32>
    %14 = arith.cmpi slt, %12, %13 : vector<16x128xi32>
    %cst_7 = arith.constant 0.000000e+00 : f32
    %15 = vector.broadcast %cst_7 : f32 to vector<16x128xf32>
    %16 = arith.select %14, %11, %15 : vector<16x128xi1>, vector<16x128xf32>
    %17 = arith.mulf %16, %16 : vector<16x128xf32>
    %cst_8 = arith.constant dense<0.000000e+00> : vector<16xf32>
    %18 = vector.multi_reduction <add>, %17, %cst_8 [1] : vector<16x128xf32> to vector<16xf32>
    %19 = vector.shape_cast %18 : vector<16xf32> to vector<16x1xf32>
    %cst_9 = arith.constant 1.562500e-02 : f32
    %20 = vector.broadcast %cst_9 : f32 to vector<16x1xf32>
    %21 = arith.mulf %19, %20 : vector<16x1xf32>
    %cst_10 = arith.constant 1.000000e-15 : f32
    %22 = vector.broadcast %cst_10 : f32 to vector<16x1xf32>
    %23 = arith.addf %21, %22 : vector<16x1xf32>
    %24 = math.rsqrt %23 : vector<16x1xf32>
    %25 = vector.broadcast %24 : vector<16x1xf32> to vector<16x128xf32>
    %26 = arith.mulf %11, %25 : vector<16x128xf32>
    %c0_11 = arith.constant 0 : index
    %c0_12 = arith.constant 0 : index
    %27 = vector.load %arg4[%c0_11, %c0_12] : memref<1x128xf32, #tpu.memory_space<vmem>>, vector<1x128xf32>
    %28 = vector.broadcast %27 : vector<1x128xf32> to vector<16x128xf32>
    %29 = arith.mulf %26, %28 : vector<16x128xf32>
    %c0_13 = arith.constant 0 : index
    %c0_14 = arith.constant 0 : index
    %30 = vector.load %arg5[%c0_13, %c0_14] : memref<1x128xf32, #tpu.memory_space<vmem>>, vector<1x128xf32>
    %31 = vector.broadcast %30 : vector<1x128xf32> to vector<16x128xf32>
    %32 = arith.addf %29, %31 : vector<16x128xf32>
    %c0_15 = arith.constant 0 : index
    %c0_16 = arith.constant 0 : index
    %33 = vector.load %arg6[%c0_15, %c0_16] : memref<16x128xf32, #tpu.memory_space<vmem>>, vector<16x128xf32>
    tpu.vector_store %arg6[%c0_15, %c0_16], %32 {strides = array<i32>} : memref<16x128xf32, #tpu.memory_space<vmem>>, vector<16x128xf32>,
    return
  }
  func.func @transform_0(%arg0: i32) -> (i32, i32) {
    %c0_i32 = arith.constant 0 : i32
    %c0_i32_0 = arith.constant 0 : i32
    return %arg0, %c0_i32 : i32, i32
  }
  func.func @transform_1(%arg0: i32) -> (i32, i32) {
    %c0_i32 = arith.constant 0 : i32
    %c0_i32_0 = arith.constant 0 : i32
    %c0_i32_1 = arith.constant 0 : i32
    return %c0_i32, %c0_i32_0 : i32, i32
  }
  func.func @transform_2(%arg0: i32) -> (i32, i32) {
    %c0_i32 = arith.constant 0 : i32
    %c0_i32_0 = arith.constant 0 : i32
    %c0_i32_1 = arith.constant 0 : i32
    return %c0_i32, %c0_i32_0 : i32, i32
  }
  func.func @transform_3(%arg0: i32) -> (i32, i32) {
    %c0_i32 = arith.constant 0 : i32
    %c0_i32_0 = arith.constant 0 : i32
    %c0_i32_1 = arith.constant 0 : i32
    return %c0_i32, %c0_i32_0 : i32, i32
  }
  func.func @transform_4(%arg0: i32) -> (i32, i32) {
    %c0_i32 = arith.constant 0 : i32
    %c0_i32_0 = arith.constant 0 : i32
    %c0_i32_1 = arith.constant 0 : i32
    return %c0_i32, %c0_i32_0 : i32, i32
  }
  func.func @transform_5(%arg0: i32) -> (i32, i32) {
    %c0_i32 = arith.constant 0 : i32
    %c0_i32_0 = arith.constant 0 : i32
    return %arg0, %c0_i32 : i32, i32
  }
}

</mosaic_0001>

<bundles_post_ra>
// kernel: tpu_custom_call.1
= control target key start
LH: loop header
LB: loop body
LE: loop exit
PB: predicated region body
PF: predicated region fallthrough
CT: control target
= control target key end

     0   :  { %10 = vsyncpa [#allocation3], 0  ;;  %s330_s0 = inlined_call_operand.hbm [shape: f32[16,32], index: 0, kind: input, shape index: {}]   ;;  %s331_s1 = inlined_call_operand.hbm [shape: f32[32,128], index: 1, kind: input, shape index: {}]   ;;  %s332_s2 = inlined_call_operand.vmem [shape: f32[1,128], index: 2, kind: input, shape index: {}]   ;;  %s333_s3 = inlined_call_operand.vmem [shape: f32[1,128], index: 3, kind: input, shape index: {}]   ;;  %s334_s4 = inlined_call_operand.vmem [shape: f32[1,128], index: 4, kind: input, shape index: {}]   ;;  %s335_s5 = inlined_call_operand.hbm [shape: f32[16,128], index: 5, kind: output, shape index: {}]  }
   0x1   :  { %11 = vsyncpa [#allocation6], 0 }
   0x2   :  { %12 = vsyncpa [#allocation4], 0  ;;  %s17_s20 = sshll.u32 %s330_s0, 4  ;;  %s268_s21 = smov [#allocation2]   ;;  %s18_s20 = int_to_ptr.hbm [resolvable:$true] %s17_s20 }
   0x3   :  { %s19_s22 = sshll.u32 %s268_s21, 4  ;;  %s30_s25 = sshll.u32 %s331_s1, 4  ;;  %s20_s22 = int_to_ptr.vmem [resolvable:$true] %s19_s22  ;;  %s31_s25 = int_to_ptr.hbm [resolvable:$true] %s30_s25 }
   0x4   :  { %s269_s26 = smov 128   ;;  %s270_s27 = smov 8  }
   0x5   :  { %25 = dma.hbm_to_vmem [thread:$0]  %s18_s20, 256, %s20_s22, [#allocation3], %s269_s26, %s269_s26, %s270_s27  }
   0x6   :  { %s271_s28 = smov [#allocation5]  }
   0x7   :  { %s32_s29 = sshll.u32 %s271_s28, 4  ;;  %s33_s29 = int_to_ptr.vmem [resolvable:$true] %s32_s29 }
   0x8   :  { %38 = dma.hbm_to_vmem [thread:$0]  %s31_s25, 512, %s33_s29, [#allocation6], %s269_s26, %s269_s26, %s270_s27  }
   0x9   :  { %262 = dma.done.wait [#allocation3], 256  }
   0xa   :  { %263 = vsyncadd [#allocation3], 4294967040 }
   0xb   :  { %264 = dma.done.wait [#allocation6], 512  }
   0xc   :  { %265 = vsyncadd [#allocation6], 4294966784  ;;  %v58_v0 = vld [vmem:[#allocation5 + $0x18] sm:$0xff]  ;;  %v57_v1 = vld [vmem:[#allocation5 + $0x10] sm:$0xff]  ;;  %vm63_vm0 = vcmask 261120   ;;  %v101_v11 = vlaneseq  ;;  %s272_s8 = smov [#allocation7]  }
   0xd   :  { %82 = vmatpush.msra.mxu0 %v58_v0  ;;  %174 = vmatpush.msra.mxu1 %v58_v0  ;;  %v56_v2 = vld [vmem:[#allocation5 + $0x8] sm:$0xff]  ;;  %v55_v3 = vld [vmem:[#allocation5] sm:$0xff]  ;;  %v53_v4 = vld [vmem:[#allocation2] sm:$0xff]  ;;  %s158_s11 = sshll.u32 %s335_s5, 4  ;;  %s159_s11 = int_to_ptr.hbm [resolvable:$true] %s158_s11 }
   0xe   :  { %v54_v5 = vld [vmem:[#allocation2 + $0x8] sm:$0xff]  ;;  %v183_v6 = vld [vmem:[%s332_s2] ss:$0 sm:$0xff]  ;;  %v102_v12 = vand.u32 127, %v101_v11 }
   0xf   :  { %83 = vmatpush.msra.mxu0 %v57_v1  ;;  %175 = vmatpush.msra.mxu1 %v57_v1  ;;  %v184_v37 = vld [vmem:[%s333_s3] ss:$0 sm:$0xff]  ;;  %s156_s3 = sshll.u32 %s272_s8, 4  ;;  %s157_s3 = int_to_ptr.vmem [resolvable:$true] %s156_s3 }
  0x10   :  { %vm103_vm1 = vcmp.lt.s32.totalorder %v102_v12, 64  ;;  %v185_v41 = vld [vmem:[%s334_s4] ss:$0 sm:$0xff] }
  0x11   :  { %84 = vmatpush.msra.mxu0 %v56_v2  ;;  %176 = vmatpush.msra.mxu1 %v56_v2 }
  0x13   :  { %85 = vmatpush.msra.mxu0 %v55_v3  ;;  %177 = vmatpush.msra.mxu1 %v55_v3 }
  0x14   :  { %172 = vmatmul.msk.f32.vlgmr.msra.gmra.mxu0 %vm63_vm0, %v53_v4  ;;  %173 = vmatmul.msk.f32.vlgmr.msra.gmra.mxu1 %vm63_vm0, %v54_v5 }
  0x91   :  { %v87_v7 = vpop.f32.mrf.mxu0  ;;  %v90_v9 = vpop.f32.mrf.mxu1 }
  0x92   :  { %v88_v8 = vadd.f32 %v183_v6, %v87_v7  ;;  %v91_v10 = vadd.f32 %v183_v6, %v90_v9 }
  0x94   :  { %93 = vadd.xlane.f32.xlu0 %v88_v8 }
  0x9c   :  { %95 = vadd.xlane.f32.xlu0 %v91_v10 }
 0x107   :  { %v94_v13 = vpop.xlane.xlu0 %93 }
 0x108   :  { %v97_v14 = vmul.f32 0.015625, %v94_v13 }
 0x10a   :  { %v99_v15 = vsub.f32 %v88_v8, %v97_v14 }
 0x10c   :  { %v104_v16 = vsel %vm103_vm1, %v99_v15, 0.0 }
 0x10d   :  { %v106_v17 = vmul.f32 %v104_v16, %v104_v16 }
 0x10f   :  { %108 = vadd.xlane.f32.xlu1 %v106_v17  ;;  %v96_v18 = vpop.xlane.xlu0 %95 }
 0x110   :  { %v98_v19 = vmul.f32 0.015625, %v96_v18 }
 0x112   :  { %v100_v20 = vsub.f32 %v91_v10, %v98_v19 }
 0x114   :  { %v105_v21 = vsel %vm103_vm1, %v100_v20, 0.0 }
 0x115   :  { %v107_v22 = vmul.f32 %v105_v21, %v105_v21 }
 0x117   :  { %110 = vadd.xlane.f32.xlu1 %v107_v22 }
 0x182   :  { %v109_v23 = vpop.xlane.xlu1 %108 }
 0x183   :  { %v112_v24 = vmul.f32 0.015625, %v109_v23 }
 0x185   :  { %v114_v25 = vadd.f32 1e-15, %v112_v24 }
 0x187   :  { %186 = vrsqrt.f32 %v114_v25  ;;  %vm122_vm3 = vweird.f32 %v114_v25 }
 0x18a   :  { %v111_v26 = vpop.xlane.xlu1 %110 }
 0x18b   :  { %v113_v27 = vmul.f32 0.015625, %v111_v26 }
 0x18d   :  { %v187_v28 = vpop.eup %186  ;;  %v115_v29 = vadd.f32 1e-15, %v113_v27 }
 0x18e   :  { %v117_v30 = vmul.f32 %v187_v28, %v114_v25  ;;  %vm123_vm2 = vweird.f32 %v187_v28 }
 0x18f   :  { %188 = vrsqrt.f32 %v115_v29  ;;  %vm124_vm4 = vmor %vm122_vm3, %vm123_vm2  ;;  %vm132_vm6 = vweird.f32 %v115_v29 }
 0x190   :  { %v118_v31 = vmul.f32 %v187_v28, %v117_v30 }
 0x192   :  { %v119_v32 = vmul.f32 0.5, %v118_v31 }
 0x194   :  { %v120_v33 = vsub.f32 1.5, %v119_v32 }
 0x195   :  { %v189_v34 = vpop.eup %188 }
 0x196   :  { %v121_v35 = vmul.f32 %v187_v28, %v120_v33  ;;  %v127_v36 = vmul.f32 %v189_v34, %v115_v29  ;;  %vm133_vm5 = vweird.f32 %v189_v34 }
 0x197   :  { %vm134_vm7 = vmor %vm132_vm6, %vm133_vm5 }
 0x198   :  { %v125_v38 = vsel %vm124_vm4, %v187_v28, %v121_v35  ;;  %v128_v39 = vmul.f32 %v189_v34, %v127_v36 }
 0x199   :  { %v136_v40 = vmul.f32 %v125_v38, %v99_v15 }
 0x19a   :  { %v129_v42 = vmul.f32 0.5, %v128_v39 }
 0x19b   :  { %v142_v43 = vmul.f32 %v184_v37, %v136_v40 }
 0x19c   :  { %v130_v44 = vsub.f32 1.5, %v129_v42 }
 0x19d   :  { %v148_v45 = vadd.f32 %v185_v41, %v142_v43 }
 0x19e   :  { %v131_v46 = vmul.f32 %v189_v34, %v130_v44 }
 0x19f   :  { %150 = vst [vmem:[#allocation7] sm:$0xff] %v148_v45 }
 0x1a0   :  { %v135_v47 = vsel %vm134_vm7, %v189_v34, %v131_v46 }
 0x1a1   :  { %v137_v48 = vmul.f32 %v135_v47, %v100_v20 }
 0x1a3   :  { %v143_v49 = vmul.f32 %v184_v37, %v137_v48 }
 0x1a5   :  { %v149_v50 = vadd.f32 %v185_v41, %v143_v49 }
 0x1a7   :  { %151 = vst [vmem:[#allocation7 + $0x8] sm:$0xff] %v149_v50 }
 0x1a8   :  { %164 = dma.vmem_to_hbm [thread:$0]  %s157_s3, 256, %s159_s11, [#allocation4], %s269_s26, %s269_s26, %s270_s27  }
 0x1a9   :  { %266 = dma.done.wait [#allocation4], 256  }
 0x1aa   :  { %267 = vsyncadd [#allocation4], 4294967040 }
 0x1ab   :  { %169 = vsyncpa [#allocation3], 1 }
 0x1ac   :  { %170 = vsyncpa [#allocation6], 1 }
 0x1ad   :  { %171 = vsyncpa [#allocation4], 1 }

</bundles_post_ra>
